<compile_context>
chip_gen: v5e
topology: v5e:2x2
jax: 0.10.0
libtpu: 0.0.40
codegen_flags: <defaults>
</compile_context>

<pallas_src>
import jax
import jax.numpy as jnp
from jax.experimental import pallas as pl
from jax.experimental.pallas import tpu as pltpu


def se_scale_kernel(x_ref, w_ref, b_ref, feat_ref, out_ref):
    # 1x1 conv on a 1x1 spatial input == matvec:  gate[c_out] = W @ x + b
    gate = jnp.dot(w_ref[...].astype(jnp.float32),
                   x_ref[...].astype(jnp.float32),
                   preferred_element_type=jnp.float32)              # [blk, 1]
    gate = jax.nn.sigmoid(gate + b_ref[...].astype(jnp.float32))     # [blk, 1] (EUP)
    # Broadcast-multiply the gate over the flattened spatial (lane) axis.
    out_ref[...] = (gate * feat_ref[...].astype(jnp.float32)).astype(out_ref.dtype)


def _pick_num_blocks(c_out):
    # Prefer a few grid steps for DMA/compute overlap + 2-TC sharding on v7x;
    # block row count must be a multiple of 8 (sublane tile) or equal c_out.
    for nb in (4, 2):
        if c_out % nb == 0 and (c_out // nb) % 8 == 0:
            return nb
    return 1


def conv1x1_sigmoid_mul(x_se, weight, bias, x_feat):
    """x_se: [1, C_in, 1, 1], weight: [C_out, C_in, 1, 1], bias: [C_out],
    x_feat: [1, C_out, H, W]  ->  [1, C_out, H, W]  (same dtype as x_feat)."""
    n, c_in, _, _ = x_se.shape
    c_out = weight.shape[0]
    _, _, h, w = x_feat.shape
    assert n == 1, "module's forward is defined for batch 1"
    hw = h * w

    # Keep native dtypes through HBM — no wrapper-side astype copy passes.
    x2 = x_se.reshape(c_in, 1)
    w2 = weight.reshape(c_out, c_in)
    b2 = bias.reshape(c_out, 1)
    f2 = x_feat.reshape(c_out, hw)

    num_blocks = _pick_num_blocks(c_out)
    blk = c_out // num_blocks

    out = pl.pallas_call(
        se_scale_kernel,
        out_shape=jax.ShapeDtypeStruct((c_out, hw), x_feat.dtype),
        grid=(num_blocks,),
        in_specs=[
            pl.BlockSpec((c_in, 1), lambda i: (0, 0)),     # x_se: full, tiny
            pl.BlockSpec((blk, c_in), lambda i: (i, 0)),   # weight rows for this block
            pl.BlockSpec((blk, 1), lambda i: (i, 0)),      # bias rows for this block
            pl.BlockSpec((blk, hw), lambda i: (i, 0)),     # feature rows for this block
        ],
        out_specs=pl.BlockSpec((blk, hw), lambda i: (i, 0)),
        compiler_params=pltpu.CompilerParams(
            dimension_semantics=("parallel",)),            # 2-TC sharding on v7x
    )(x2, w2, b2, f2)

    return out.reshape(1, c_out, h, w)


if __name__ == "__main__":
    # Shapes from the module: x299 = [1, 36, 1, 1], x296 = [1, 864, 14, 14]
    C_IN, C_OUT, H, W = 36, 864, 14, 14

    key = jax.random.PRNGKey(0)
    k1, k2, k3, k4 = jax.random.split(key, 4)

    x_se = jax.random.normal(k1, (1, C_IN, 1, 1), dtype=jnp.float32)
    x_feat = jax.random.normal(k2, (1, C_OUT, H, W), dtype=jnp.float32)
    # Deterministic Conv2d(36, 864, 1x1) parameters.
    weight = jax.random.normal(k3, (C_OUT, C_IN, 1, 1), dtype=jnp.float32) * 0.05
    bias = jax.random.normal(k4, (C_OUT,), dtype=jnp.float32) * 0.05

    out = conv1x1_sigmoid_mul(x_se, weight, bias, x_feat)
    out = jax.block_until_ready(out)

    # Pure-JAX reference check of the forward semantics.
    gate_ref = jax.nn.sigmoid(
        weight.reshape(C_OUT, C_IN) @ x_se.reshape(C_IN, 1) + bias.reshape(C_OUT, 1)
    ).reshape(1, C_OUT, 1, 1)
    ref = gate_ref * x_feat
    assert out.shape == (1, C_OUT, H, W)
    assert out.dtype == x_feat.dtype
    assert jnp.allclose(out, ref, atol=1e-5, rtol=1e-5)

    print("KERNEL_OK")
</pallas_src>

<mosaic_0001>
module attributes {stable_mosaic.version = 11 : i64} {
  func.func @se_scale_kernel(%arg0: i32, %arg1: memref<36x1xf32, #tpu.memory_space<vmem>>, %arg2: memref<216x36xf32, #tpu.memory_space<vmem>>, %arg3: memref<216x1xf32, #tpu.memory_space<vmem>>, %arg4: memref<216x196xf32, #tpu.memory_space<vmem>>, %arg5: memref<216x196xf32, #tpu.memory_space<vmem>>) attributes {dimension_semantics = [#tpu.dimension_semantics<parallel>], iteration_bounds = array<i64: 4>, scalar_prefetch = 0 : i64, scratch_operands = 0 : i64, tpu.core_type = #tpu.core_type<tc>, window_params = [{pipeline_mode = #tpu.pipeline_mode<synchronous>, transform_indices = @transform_0, window_bounds = array<i64: 36, 1>}, {transform_indices = @transform_1, window_bounds = array<i64: 216, 36>}, {transform_indices = @transform_2, window_bounds = array<i64: 216, 1>}, {transform_indices = @transform_3, window_bounds = array<i64: 216, 196>}, {transform_indices = @transform_4, window_bounds = array<i64: 216, 196>}]} {
    %c0 = arith.constant 0 : index
    %c0_0 = arith.constant 0 : index
    %0 = vector.load %arg2[%c0, %c0_0] : memref<216x36xf32, #tpu.memory_space<vmem>>, vector<216x36xf32>
    %c0_1 = arith.constant 0 : index
    %c0_2 = arith.constant 0 : index
    %1 = vector.load %arg1[%c0_1, %c0_2] : memref<36x1xf32, #tpu.memory_space<vmem>>, vector<36x1xf32>
    %cst = arith.constant dense<0.000000e+00> : vector<216x1xf32>
    %2 = tpu.matmul %0, %1, %cst {dimension_numbers = #tpu.dot_dimension_numbers<[1], [0], [0], [1], [0, 0, 1, 1], [], []>} : vector<216x36xf32>, vector<36x1xf32>, vector<216x1xf32> -> vector<216x1xf32>
    %c0_3 = arith.constant 0 : index
    %c0_4 = arith.constant 0 : index
    %3 = vector.load %arg3[%c0_3, %c0_4] : memref<216x1xf32, #tpu.memory_space<vmem>>, vector<216x1xf32>
    %4 = arith.addf %2, %3 : vector<216x1xf32>
    %5 = arith.negf %4 : vector<216x1xf32>
    %6 = math.exp %5 : vector<216x1xf32>
    %cst_5 = arith.constant 1.000000e+00 : f32
    %7 = vector.broadcast %cst_5 : f32 to vector<216x1xf32>
    %8 = arith.addf %7, %6 : vector<216x1xf32>
    %9 = arith.divf %7, %8 : vector<216x1xf32>
    %c0_6 = arith.constant 0 : index
    %c0_7 = arith.constant 0 : index
    %10 = vector.load %arg4[%c0_6, %c0_7] : memref<216x196xf32, #tpu.memory_space<vmem>>, vector<216x196xf32>
    %11 = vector.broadcast %9 : vector<216x1xf32> to vector<216x196xf32>
    %12 = arith.mulf %11, %10 : vector<216x196xf32>
    %c0_8 = arith.constant 0 : index
    %c0_9 = arith.constant 0 : index
    %13 = vector.load %arg5[%c0_8, %c0_9] : memref<216x196xf32, #tpu.memory_space<vmem>>, vector<216x196xf32>
    tpu.vector_store %arg5[%c0_8, %c0_9], %12 {strides = array<i32>} : memref<216x196xf32, #tpu.memory_space<vmem>>, vector<216x196xf32>,
    return
  }
  func.func @transform_0(%arg0: i32) -> (i32, i32) {
    %c0_i32 = arith.constant 0 : i32
    %c0_i32_0 = arith.constant 0 : i32
    %c0_i32_1 = arith.constant 0 : i32
    return %c0_i32, %c0_i32_0 : i32, i32
  }
  func.func @transform_1(%arg0: i32) -> (i32, i32) {
    %c0_i32 = arith.constant 0 : i32
    %c0_i32_0 = arith.constant 0 : i32
    return %arg0, %c0_i32 : i32, i32
  }
  func.func @transform_2(%arg0: i32) -> (i32, i32) {
    %c0_i32 = arith.constant 0 : i32
    %c0_i32_0 = arith.constant 0 : i32
    return %arg0, %c0_i32 : i32, i32
  }
  func.func @transform_3(%arg0: i32) -> (i32, i32) {
    %c0_i32 = arith.constant 0 : i32
    %c0_i32_0 = arith.constant 0 : i32
    return %arg0, %c0_i32 : i32, i32
  }
  func.func @transform_4(%arg0: i32) -> (i32, i32) {
    %c0_i32 = arith.constant 0 : i32
    %c0_i32_0 = arith.constant 0 : i32
    return %arg0, %c0_i32 : i32, i32
  }
}

</mosaic_0001>

<bundles_post_ra>
// kernel: tpu_custom_call.1
= control target key start
LH: loop header
LB: loop body
LE: loop exit
PB: predicated region body
PF: predicated region fallthrough
CT: control target
= control target key end

     0   :  { %s1625_s15 = smov 0   ;;  %s2593_s0 = inlined_call_operand.vmem [shape: f32[36,1], index: 0, kind: input, shape index: {}]   ;;  %s2594_s1 = inlined_call_operand.vmem [shape: f32[864,36], index: 1, kind: input, shape index: {}]   ;;  %s2595_s2 = inlined_call_operand.vmem [shape: f32[864,1], index: 2, kind: input, shape index: {}]   ;;  %s2596_s3 = inlined_call_operand.vmem [shape: f32[864,196], index: 3, kind: input, shape index: {}]   ;;  %s2597_s4 = inlined_call_operand.vmem [shape: f32[864,196], index: 4, kind: output, shape index: {}]  }
   0x1 LB: > { %s1386_s16 = sadd.s32 4294967295, %s1597_s15   ;;  %p1390_p0 = scmp.ge.s32.totalorder %s1597_s15, 1  ;;  %s1597_s15 = sphi %s1625_s15, %s14_s15  }
   0x2   : > { %p186_p1 = scmp.lt.s32.totalorder %s1597_s15, 5 }
   0x4   : > { %p187_p2 = pnand %p1390_p0, %p186_p1 }
   0x5   : > { %s224_s21 = smul.u32 (!%p187_p2), 27, %s1386_s16 }
   0x6   : > { %190 = sbr.rel (%p187_p2) target bundleno = 395 (0x18b), region = 36 }
   0x7   : > { %p225_p3 = scmp.lt.s32.totalorder (!%p187_p2), %s224_s21, 107 }
   0xb   : > { %v281_v0 = vld [vmem:[%s2593_s0 + $0x20] sm:$0xf]  ;;  %vm391_vm0 = vcmask 1043456   ;;  %v280_v1 = vld [vmem:[%s2593_s0 + $0x18] sm:$0xff]  ;;  %v279_v2 = vld [vmem:[%s2593_s0 + $0x10] sm:$0xff]  ;;  %s2673_s21 = smov (!%p225_p3, %s224_s21), 107 }
   0xc   : > { %1397 = vmatpush.msk.msra.mxu0 %vm391_vm0, %v281_v0  ;;  %1456 = vmatpush.msk.msra.mxu1 %vm391_vm0, %v281_v0  ;;  %v278_v3 = vld [vmem:[%s2593_s0 + $0x8] sm:$0xff]  ;;  %v277_v4 = vld [vmem:[%s2593_s0] sm:$0xff]  ;;  %s1391_s28 = sshll.u32 %s2673_s21, 3  ;;  %vm309_vm1 = vcmask 293888   ;;  %v1599_v40 = vmov 0   ;;  %s1454_s9 = sshll.u32 %s2673_s21, 4 }
   0xd   : > { %1457 = vmatpush.msk.msra.mxu2 %vm391_vm0, %v281_v0  ;;  %1458 = vmatpush.msk.msra.mxu3 %vm391_vm0, %v281_v0  ;;  %s1656_s5 = scalar_lea.vmem %s2594_s1, %s1391_s28  ;;  %s1717_s8 = scalar_lea.vmem %s2595_s2, %s1391_s28 }
   0xe   : > { %407 = vmatpush.msra.mxu0 %v280_v1  ;;  %1459 = vmatpush.msra.mxu1 %v280_v1  ;;  %v250_v5 = vld [vmem:[%s1656_s5] sm:$0xff]  ;;  %v257_v6 = vld [vmem:[%s1656_s5 + $0x38] sm:$0xff]  ;;  %v264_v7 = vld [vmem:[%s1656_s5 + $0x70] sm:$0xff]  ;;  %s2445_s12 = scalar_lea.vmem %s2596_s3, %s1454_s9  ;;  %s2455_s16 = scalar_lea.vmem %s2597_s4, %s1454_s9 }
   0xf   : > { %1460 = vmatpush.msra.mxu2 %v280_v1  ;;  %1461 = vmatpush.msra.mxu3 %v280_v1  ;;  %v271_v8 = vld [vmem:[%s1656_s5 + $0xa8] sm:$0xff]  ;;  %v258_v10 = vld [vmem:[%s1656_s5 + $0x40] sm:$0xff]  ;;  %v265_v11 = vld [vmem:[%s1656_s5 + $0x78] sm:$0xff] }
  0x10   : > { %408 = vmatpush.msra.mxu0 %v279_v2  ;;  %1462 = vmatpush.msra.mxu1 %v279_v2  ;;  %v251_v9 = vld [vmem:[%s1656_s5 + $0x8] sm:$0xff]  ;;  %v272_v12 = vld [vmem:[%s1656_s5 + $0xb0] sm:$0xff]  ;;  %v266_v15 = vld [vmem:[%s1656_s5 + $0x80] sm:$0xff] }
  0x11   : > { %1463 = vmatpush.msra.mxu2 %v279_v2  ;;  %1464 = vmatpush.msra.mxu3 %v279_v2  ;;  %v252_v13 = vld [vmem:[%s1656_s5 + $0x10] sm:$0xff]  ;;  %v259_v14 = vld [vmem:[%s1656_s5 + $0x48] sm:$0xff]  ;;  %v273_v16 = vld [vmem:[%s1656_s5 + $0xb8] sm:$0xff] }
  0x12   : > { %409 = vmatpush.msra.mxu0 %v278_v3  ;;  %1465 = vmatpush.msra.mxu1 %v278_v3  ;;  %v253_v17 = vld [vmem:[%s1656_s5 + $0x18] sm:$0xff]  ;;  %v260_v18 = vld [vmem:[%s1656_s5 + $0x50] sm:$0xff]  ;;  %v267_v19 = vld [vmem:[%s1656_s5 + $0x88] sm:$0xff] }
  0x13   : > { %1466 = vmatpush.msra.mxu2 %v278_v3  ;;  %1467 = vmatpush.msra.mxu3 %v278_v3  ;;  %v274_v20 = vld [vmem:[%s1656_s5 + $0xc0] sm:$0xff]  ;;  %v261_v22 = vld [vmem:[%s1656_s5 + $0x58] sm:$0xff]  ;;  %v268_v23 = vld [vmem:[%s1656_s5 + $0x90] sm:$0xff] }
  0x14   : > { %410 = vmatpush.msra.mxu0 %v277_v4  ;;  %1468 = vmatpush.msra.mxu1 %v277_v4  ;;  %v254_v21 = vld [vmem:[%s1656_s5 + $0x20] sm:$0xff]  ;;  %v275_v24 = vld [vmem:[%s1656_s5 + $0xc8] sm:$0xff]  ;;  %v269_v27 = vld [vmem:[%s1656_s5 + $0x98] sm:$0xff] }
  0x15   : > { %1469 = vmatpush.msra.mxu2 %v277_v4  ;;  %1470 = vmatpush.msra.mxu3 %v277_v4  ;;  %v255_v25 = vld [vmem:[%s1656_s5 + $0x28] sm:$0xff]  ;;  %v262_v26 = vld [vmem:[%s1656_s5 + $0x60] sm:$0xff]  ;;  %v276_v28 = vld [vmem:[%s1656_s5 + $0xd0] sm:$0xff] }
  0x16   : > { %1398 = vmatmul.msk.f32.vlgmr.msra.gmra.mxu0 %vm309_vm1, %v250_v5  ;;  %1405 = vmatmul.msk.f32.vlgmr.msra.gmra.mxu1 %vm309_vm1, %v257_v6  ;;  %v256_v29 = vld [vmem:[%s1656_s5 + $0x30] sm:$0xff]  ;;  %v263_v30 = vld [vmem:[%s1656_s5 + $0x68] sm:$0xff]  ;;  %v270_v31 = vld [vmem:[%s1656_s5 + $0xa0] sm:$0xff] }
  0x17   : > { %1412 = vmatmul.msk.f32.vlgmr.msra.gmra.mxu2 %vm309_vm1, %v264_v7  ;;  %1419 = vmatmul.msk.f32.vlgmr.msra.gmra.mxu3 %vm309_vm1, %v271_v8  ;;  %v282_v32 = vld [vmem:[%s1717_s8] sm:$0xff]  ;;  %v289_v33 = vld [vmem:[%s1717_s8 + $0x38] sm:$0xff]  ;;  %v296_v41 = vld [vmem:[%s1717_s8 + $0x70] sm:$0xff] }
  0x18   : > { %1481 = vset.pattern.permute.xlu1 %v1599_v40  ;;  %1480 = vset.pattern.permute.xlu0 %v1599_v40  ;;  %v303_v42 = vld [vmem:[%s1717_s8 + $0xa8] sm:$0xff]  ;;  %v290_v44 = vld [vmem:[%s1717_s8 + $0x40] sm:$0xff]  ;;  %v297_v61 = vld [vmem:[%s1717_s8 + $0x78] sm:$0xff] }
  0x19   : > { %1482 = vset.pattern.permute.xlu2 %v1599_v40  ;;  %v283_v43 = vld [vmem:[%s1717_s8 + $0x8] sm:$0xff]  ;;  %v304_v62 = vld [vmem:[%s1717_s8 + $0xb0] sm:$0xff] }
  0x1a   : > { %v284_v63 = vld [vmem:[%s1717_s8 + $0x10] sm:$0xff]  ;;  %v291_v0 = vld [vmem:[%s1717_s8 + $0x48] sm:$0xff] }
  0x1e   : > { %1399 = vmatmul.msk.f32.gmra.mxu0 %vm309_vm1, %v251_v9  ;;  %1406 = vmatmul.msk.f32.gmra.mxu1 %vm309_vm1, %v258_v10 }
  0x1f   : > { %1413 = vmatmul.msk.f32.gmra.mxu2 %vm309_vm1, %v265_v11  ;;  %1420 = vmatmul.msk.f32.gmra.mxu3 %vm309_vm1, %v272_v12 }
  0x26   : > { %1400 = vmatmul.msk.f32.gmra.mxu0 %vm309_vm1, %v252_v13  ;;  %1407 = vmatmul.msk.f32.gmra.mxu1 %vm309_vm1, %v259_v14 }
  0x27   : > { %1414 = vmatmul.msk.f32.gmra.mxu2 %vm309_vm1, %v266_v15  ;;  %1421 = vmatmul.msk.f32.gmra.mxu3 %vm309_vm1, %v273_v16 }
  0x2e   : > { %1401 = vmatmul.msk.f32.gmra.mxu0 %vm309_vm1, %v253_v17  ;;  %1408 = vmatmul.msk.f32.gmra.mxu1 %vm309_vm1, %v260_v18 }
  0x2f   : > { %1415 = vmatmul.msk.f32.gmra.mxu2 %vm309_vm1, %v267_v19  ;;  %1422 = vmatmul.msk.f32.gmra.mxu3 %vm309_vm1, %v274_v20 }
  0x36   : > { %1402 = vmatmul.msk.f32.gmra.mxu0 %vm309_vm1, %v254_v21  ;;  %1409 = vmatmul.msk.f32.gmra.mxu1 %vm309_vm1, %v261_v22 }
  0x37   : > { %1416 = vmatmul.msk.f32.gmra.mxu2 %vm309_vm1, %v268_v23  ;;  %1423 = vmatmul.msk.f32.gmra.mxu3 %vm309_vm1, %v275_v24  ;;  %v298_v24 = vld [vmem:[%s1717_s8 + $0x80] sm:$0xff] }
  0x3e   : > { %1403 = vmatmul.msk.f32.gmra.mxu0 %vm309_vm1, %v255_v25  ;;  %1410 = vmatmul.msk.f32.gmra.mxu1 %vm309_vm1, %v262_v26  ;;  %v305_v25 = vld [vmem:[%s1717_s8 + $0xb8] sm:$0xff] }
  0x3f   : > { %1417 = vmatmul.msk.f32.gmra.mxu2 %vm309_vm1, %v269_v27  ;;  %1424 = vmatmul.msk.f32.gmra.mxu3 %vm309_vm1, %v276_v28 }
  0x46   : > { %1404 = vmatmul.msk.f32.gmra.mxu0 %vm309_vm1, %v256_v29  ;;  %1411 = vmatmul.msk.f32.gmra.mxu1 %vm309_vm1, %v263_v30  ;;  %v285_v29 = vld [vmem:[%s1717_s8 + $0x18] sm:$0xff]  ;;  %v292_v30 = vld [vmem:[%s1717_s8 + $0x50] sm:$0xff] }
  0x47   : > { %1418 = vmatmul.msk.f32.gmra.mxu2 %vm309_vm1, %v270_v31 }
  0x93   : > { %v412_v34 = vpop.f32.mrf.mxu0  ;;  %v433_v35 = vpop.f32.mrf.mxu1 }
  0x94   : > { %v413_v36 = vadd.f32 %v412_v34, %v282_v32  ;;  %v434_v37 = vadd.f32 %v433_v35, %v289_v33 }
  0x96   : > { %v1425_v38 = vmul.f32 -1.442695, %v413_v36  ;;  %v1432_v39 = vmul.f32 -1.442695, %v434_v37 }
  0x98   : > { %1483 = vpow2.f32 %v1425_v38 }
  0x99   : > { %1485 = vpow2.f32 %v1432_v39 }
  0x9a   : > { %v454_v45 = vpop.f32.mrf.mxu2  ;;  %v475_v46 = vpop.f32.mrf.mxu3 }
  0x9b   : > { %v455_v47 = vadd.f32 %v454_v45, %v296_v41  ;;  %v476_v48 = vadd.f32 %v475_v46, %v303_v42  ;;  %v415_v49 = vpop.f32.mrf.mxu0  ;;  %v436_v50 = vpop.f32.mrf.mxu1 }
  0x9c   : > { %v416_v51 = vadd.f32 %v415_v49, %v283_v43  ;;  %v437_v52 = vadd.f32 %v436_v50, %v290_v44 }
  0x9d   : > { %v1439_v53 = vmul.f32 -1.442695, %v455_v47  ;;  %v1446_v54 = vmul.f32 -1.442695, %v476_v48 }
  0x9e   : > { %v1484_v55 = vpop.eup %1483  ;;  %v1426_v58 = vmul.f32 -1.442695, %v416_v51  ;;  %v1433_v60 = vmul.f32 -1.442695, %v437_v52 }
  0x9f   : > { %v1486_v56 = vpop.eup %1485  ;;  %v1725_v57 = vadd.f32 1.0, %v1484_v55  ;;  %1487 = vpow2.f32 %v1439_v53 }
  0xa0   : > { %v1727_v59 = vadd.f32 1.0, %v1486_v56  ;;  %1489 = vpow2.f32 %v1446_v54 }
  0xa1   : > { %1491 = vrcp.f32 %v1725_v57  ;;  %v612_v10 = vand.u32 2147483648, %v1725_v57  ;;  %v610_v13 = vand.u32 2147483647, %v1725_v57  ;;  %vm606_vm2 = vweird.f32 %v1725_v57 }
  0xa2   : > { %1493 = vrcp.f32 %v1727_v59  ;;  %v457_v1 = vpop.f32.mrf.mxu2  ;;  %v478_v2 = vpop.f32.mrf.mxu3  ;;  %v717_v7 = vand.u32 2147483648, %v1727_v59  ;;  %v715_v17 = vand.u32 2147483647, %v1727_v59  ;;  %vm711_vm3 = vweird.f32 %v1727_v59 }
  0xa3   : > { %1495 = vpow2.f32 %v1426_v58  ;;  %v458_v3 = vadd.f32 %v457_v1, %v297_v61  ;;  %v479_v4 = vadd.f32 %v478_v2, %v304_v62  ;;  %v418_v5 = vpop.f32.mrf.mxu0  ;;  %v439_v6 = vpop.f32.mrf.mxu1  ;;  %v1756_v27 = vor.u32 1.1754944e-38, %v612_v10 }
  0xa4   : > { %1497 = vpow2.f32 %v1433_v60  ;;  %v419_v8 = vadd.f32 %v418_v5, %v284_v63  ;;  %v440_v9 = vadd.f32 %v439_v6, %v291_v0  ;;  %v1747_v21 = vor.u32 1.1754944e-38, %v717_v7  ;;  %v299_v0 = vld [vmem:[%s1717_s8 + $0x88] sm:$0xff]  ;;  %v286_v7 = vld [vmem:[%s1717_s8 + $0x20] sm:$0xff] }
  0xa5   : > { %v1488_v11 = vpop.eup %1487  ;;  %v1440_v12 = vmul.f32 -1.442695, %v458_v3  ;;  %v1447_v16 = vmul.f32 -1.442695, %v479_v4  ;;  %vm1764_vm5 = vcmp.eq.f32.partialorder %v610_v13, 8.507059e+37  ;;  %vm1774_vm6 = vcmp.eq.f32.partialorder %v715_v17, 8.507059e+37 }
  0xa6   : > { %v1490_v14 = vpop.eup %1489  ;;  %v1738_v15 = vadd.f32 1.0, %v1488_v11  ;;  %v1427_v20 = vmul.f32 -1.442695, %v419_v8  ;;  %v1434_v23 = vmul.f32 -1.442695, %v440_v9  ;;  %v293_v8 = vld [vmem:[%s1717_s8 + $0x58] sm:$0xff] }
  0xa7   : > { %v1742_v18 = vpop.eup %1491  ;;  %v1744_v19 = vadd.f32 1.0, %v1490_v14  ;;  %1499 = vpow2.f32 %v1440_v12 }
  0xa8   : > { %v1749_v22 = vpop.eup %1493  ;;  %1501 = vrcp.f32 %v1738_v15  ;;  %v602_v26 = vmul.f32 %v1742_v18, %v1725_v57  ;;  %vm607_vm4 = vweird.f32 %v1742_v18  ;;  %v820_v33 = vand.u32 2147483647, %v1738_v15 }
  0xa9   : > { %v1496_v28 = vpop.eup %1495  ;;  %1503 = vrcp.f32 %v1744_v19  ;;  %v707_v31 = vmul.f32 %v1749_v22, %v1727_v59  ;;  %v822_v39 = vand.u32 2147483648, %v1738_v15  ;;  %vm816_vm7 = vweird.f32 %v1738_v15  ;;  %vm1799_vm9 = vmor %vm606_vm2, %vm607_vm4 }
  0xaa   : > { %v1498_v34 = vpop.eup %1497  ;;  %v1769_v35 = vadd.f32 1.0, %v1496_v28  ;;  %1505 = vpow2.f32 %v1447_v16  ;;  %v460_v36 = vpop.f32.mrf.mxu2  ;;  %v603_v38 = vsub.f32 1.0, %v602_v26  ;;  %vm712_vm8 = vweird.f32 %v1749_v22 }
  0xab   : > { %v481_v37 = vpop.f32.mrf.mxu3  ;;  %v1772_v40 = vadd.f32 1.0, %v1498_v34  ;;  %1507 = vpow2.f32 %v1427_v20  ;;  %v461_v41 = vadd.f32 %v460_v36, %v298_v24  ;;  %v421_v43 = vpop.f32.mrf.mxu0  ;;  %v708_v48 = vsub.f32 1.0, %v707_v31  ;;  %vm713_vm12 = vmor %vm711_vm3, %vm712_vm8 }
  0xac   : > { %v482_v42 = vadd.f32 %v481_v37, %v305_v25  ;;  %v442_v44 = vpop.f32.mrf.mxu1  ;;  %1509 = vrcp.f32 %v1769_v35  ;;  %v422_v46 = vadd.f32 %v421_v43, %v285_v29  ;;  %v604_v52 = vmul.f32 %v1742_v18, %v603_v38 }
  0xad   : > { %v443_v47 = vadd.f32 %v442_v44, %v292_v30  ;;  %v1500_v49 = vpop.eup %1499  ;;  %1511 = vrcp.f32 %v1772_v40  ;;  %v1441_v50 = vmul.f32 -1.442695, %v461_v41  ;;  %v709_v58 = vmul.f32 %v1749_v22, %v708_v48 }
  0xae   : > { %v1448_v51 = vmul.f32 -1.442695, %v482_v42  ;;  %v1782_v53 = vpop.eup %1501  ;;  %v1784_v54 = vadd.f32 1.0, %v1500_v49  ;;  %1513 = vpow2.f32 %v1434_v23  ;;  %v1428_v55 = vmul.f32 -1.442695, %v422_v46 }
  0xaf   : > { %v1787_v56 = vpop.eup %1503  ;;  %1515 = vpow2.f32 %v1441_v50  ;;  %v605_v60 = vadd.f32 %v1742_v18, %v604_v52  ;;  %v812_v61 = vmul.f32 %v1782_v53, %v1738_v15  ;;  %v1435_v63 = vmul.f32 -1.442695, %v443_v47  ;;  %v287_v47 = vld [vmem:[%s1717_s8 + $0x28] sm:$0xff]  ;;  %v294_v52 = vld [vmem:[%s1717_s8 + $0x60] sm:$0xff] }
  0xb0   : > { %v1506_v62 = vpop.eup %1505  ;;  %1517 = vrcp.f32 %v1784_v54  ;;  %vm817_vm10 = vweird.f32 %v1782_v53  ;;  %v823_v2 = vor.u32 1.1754944e-38, %v822_v39  ;;  %v710_v5 = vadd.f32 %v1749_v22, %v709_v58  ;;  %v300_v39 = vld [vmem:[%s1717_s8 + $0x90] sm:$0xff] }
  0xb1   : > { %v1508_v3 = vpop.eup %1507  ;;  %v1804_v4 = vadd.f32 1.0, %v1506_v62  ;;  %1519 = vpow2.f32 %v1448_v51  ;;  %v609_v6 = vsel %vm1799_vm9, %v1742_v18, %v605_v60  ;;  %vm1812_vm11 = vcmp.eq.f32.partialorder %v820_v33, 8.507059e+37  ;;  %vm818_vm15 = vmor %vm816_vm7, %vm817_vm10 }
  0xb2   : > { %v1816_v9 = vpop.eup %1509  ;;  %v1818_v10 = vadd.f32 1.0, %v1508_v3  ;;  %1521 = vpow2.f32 %v1428_v55  ;;  %v463_v11 = vpop.f32.mrf.mxu2  ;;  %v614_v12 = vsel %vm1764_vm5, %v1756_v27, %v609_v6  ;;  %v813_v13 = vsub.f32 1.0, %v812_v61 }
  0xb3   : > { %v1827_v14 = vpop.eup %1511  ;;  %1523 = vrcp.f32 %v1804_v4  ;;  %v464_v16 = vadd.f32 %v463_v11, %v299_v0  ;;  %v714_v17 = vsel %vm713_vm12, %v1749_v22, %v710_v5  ;;  %1062 = vperm.xlu0 %1480, %v614_v12   ;;  %v424_v18 = vpop.f32.mrf.mxu0  ;;  %v917_v23 = vmul.f32 %v1787_v56, %v1744_v19 }
  0xb4   : > { %v445_v20 = vpop.f32.mrf.mxu1  ;;  %v1514_v59 = vpop.eup %1513  ;;  %1525 = vrcp.f32 %v1818_v10  ;;  %v719_v24 = vsel %vm1774_vm6, %v1747_v21, %v714_v17  ;;  %v425_v25 = vadd.f32 %v424_v18, %v286_v7  ;;  %v814_v29 = vmul.f32 %v1782_v53, %v813_v13 }
  0xb5   : > { %v446_v26 = vadd.f32 %v445_v20, %v293_v8  ;;  %v1516_v27 = vpop.eup %1515  ;;  %v1837_v28 = vadd.f32 1.0, %v1514_v59  ;;  %1527 = vpow2.f32 %v1435_v63  ;;  %v1442_v22 = vmul.f32 -1.442695, %v464_v16  ;;  %1097 = vperm.xlu1 %1481, %v719_v24   ;;  %v301_v24 = vld [vmem:[%s1717_s8 + $0x98] sm:$0xff] }
  0xb6   : > { %v1840_v30 = vpop.eup %1517  ;;  %v1842_v31 = vadd.f32 1.0, %v1516_v27  ;;  %v1429_v32 = vmul.f32 -1.442695, %v425_v25  ;;  %v918_v34 = vsub.f32 1.0, %v917_v23  ;;  %v815_v21 = vadd.f32 %v1782_v53, %v814_v29 }
  0xb7   : > { %v1436_v33 = vmul.f32 -1.442695, %v446_v26  ;;  %v1520_v36 = vpop.eup %1519  ;;  %1529 = vrcp.f32 %v1837_v28  ;;  %vm921_vm13 = vweird.f32 %v1744_v19  ;;  %vm922_vm14 = vweird.f32 %v1787_v56 }
  0xb8   : > { %v1522_v37 = vpop.eup %1521  ;;  %1531 = vrcp.f32 %v1842_v31  ;;  %v1849_v38 = vadd.f32 1.0, %v1520_v36  ;;  %v919_v41 = vmul.f32 %v1787_v56, %v918_v34  ;;  %v925_v42 = vand.u32 2147483647, %v1744_v19  ;;  %vm923_vm1 = vmor %vm921_vm13, %vm922_vm14 }
  0xb9   : > { %v1858_v43 = vpop.eup %1523  ;;  %v1860_v44 = vadd.f32 1.0, %v1522_v37  ;;  %1533 = vpow2.f32 %v1442_v22  ;;  %v819_v45 = vsel %vm818_vm15, %v1782_v53, %v815_v21  ;;  %v927_v46 = vand.u32 2147483648, %v1744_v19 }
  0xba   : > { %v1865_v48 = vpop.eup %1525  ;;  %1535 = vrcp.f32 %v1849_v38  ;;  %v824_v15 = vsel %vm1812_vm11, %v823_v2, %v819_v45  ;;  %v466_v49 = vpop.f32.mrf.mxu2  ;;  %v920_v50 = vadd.f32 %v1787_v56, %v919_v41  ;;  %vm1871_vm0 = vcmp.eq.f32.partialorder %v925_v42, 8.507059e+37 }
  0xbb   : > { %v1528_v55 = vpop.eup %1527  ;;  %1537 = vrcp.f32 %v1860_v44  ;;  %1132 = vperm.xlu2 %1482, %v824_v15   ;;  %v467_v53 = vadd.f32 %v466_v49, %v300_v39  ;;  %v928_v58 = vor.u32 1.1754944e-38, %v927_v46  ;;  %v427_v60 = vpop.f32.mrf.mxu0  ;;  %v722_v62 = vmul.f32 %v1827_v14, %v1772_v40 }
  0xbc   : > { %v448_v61 = vpop.f32.mrf.mxu1  ;;  %v1883_v63 = vadd.f32 1.0, %v1528_v55  ;;  %1539 = vpow2.f32 %v1429_v32  ;;  %v924_v0 = vsel %vm923_vm1, %v1787_v56, %v920_v50  ;;  %v428_v1 = vadd.f32 %v427_v60, %v287_v47 }
  0xbd   : > { %v1886_v2 = vpop.eup %1529  ;;  %1541 = vpow2.f32 %v1436_v33  ;;  %v1443_v3 = vmul.f32 -1.442695, %v467_v53  ;;  %v929_v19 = vsel %vm1871_vm0, %v928_v58, %v924_v0  ;;  %v449_v5 = vadd.f32 %v448_v61, %v294_v52  ;;  %v288_v58 = vld [vmem:[%s1717_s8 + $0x30] sm:$0xff] }
  0xbe   : > { %v1890_v6 = vpop.eup %1531  ;;  %1543 = vrcp.f32 %v1883_v63  ;;  %1167 = vperm.xlu0 %1480, %v929_v19   ;;  %v1430_v7 = vmul.f32 -1.442695, %v428_v1  ;;  %v723_v8 = vsub.f32 1.0, %v722_v62  ;;  %vm726_vm2 = vweird.f32 %v1772_v40  ;;  %v295_v1 = vld [vmem:[%s1717_s8 + $0x68] sm:$0xff] }
  0xbf   : > { %v1534_v57 = vpop.eup %1533  ;;  %1545 = vpow2.f32 %v1443_v3  ;;  %v1437_v56 = vmul.f32 -1.442695, %v449_v5  ;;  %vm727_vm3 = vweird.f32 %v1827_v14  ;;  %v730_v11 = vand.u32 2147483647, %v1772_v40 }
  0xc0   : > { %v1896_v12 = vpop.eup %1535  ;;  %v1898_v13 = vadd.f32 1.0, %v1534_v57  ;;  %1547 = vpow2.f32 %v1430_v7  ;;  %v724_v16 = vmul.f32 %v1827_v14, %v723_v8  ;;  %v732_v17 = vand.u32 2147483648, %v1772_v40  ;;  %vm1904_vm4 = vmor %vm726_vm2, %vm727_vm3  ;;  %v306_v8 = vld [vmem:[%s1717_s8 + $0xc0] sm:$0xff]  ;;  %v484_v57 = vpop.f32.mrf.mxu3 }
  0xc1   : > { %v1902_v18 = vpop.eup %1537  ;;  %1549 = vpow2.f32 %v1437_v56  ;;  %vm1908_vm5 = vcmp.eq.f32.partialorder %v730_v11, 8.507059e+37  ;;  %v932_v59 = vmul.f32 %v1858_v43, %v1804_v4  ;;  %vm936_vm6 = vweird.f32 %v1804_v4 }
  0xc2   : > { %v1540_v25 = vpop.eup %1539  ;;  %1551 = vrcp.f32 %v1898_v13  ;;  %v725_v40 = vadd.f32 %v1827_v14, %v724_v16  ;;  %v733_v26 = vor.u32 1.1754944e-38, %v732_v17  ;;  %vm937_vm7 = vweird.f32 %v1858_v43  ;;  %v469_v27 = vpop.f32.mrf.mxu2 }
  0xc3   : > { %v1542_v22 = vpop.eup %1541  ;;  %v1919_v29 = vadd.f32 1.0, %v1540_v25  ;;  %v933_v32 = vsub.f32 1.0, %v932_v59  ;;  %v940_v33 = vand.u32 2147483647, %v1804_v4  ;;  %v942_v34 = vand.u32 2147483648, %v1804_v4  ;;  %v430_v60 = vpop.f32.mrf.mxu0  ;;  %vm938_vm10 = vmor %vm936_vm6, %vm937_vm7 }
  0xc4   : > { %v1923_v36 = vpop.eup %1543  ;;  %v1925_v21 = vadd.f32 1.0, %v1542_v22  ;;  %v729_v37 = vsel %vm1904_vm4, %v1827_v14, %v725_v40  ;;  %v470_v39 = vadd.f32 %v469_v27, %v301_v24  ;;  %v617_v41 = vmul.f32 %v1816_v9, %v1769_v35  ;;  %v451_v3 = vpop.f32.mrf.mxu1 }
  0xc5   : > { %v1546_v42 = vpop.eup %1545  ;;  %1553 = vrcp.f32 %v1919_v29  ;;  %v734_v45 = vsel %vm1908_vm5, %v733_v26, %v729_v37  ;;  %v934_v46 = vmul.f32 %v1858_v43, %v933_v32  ;;  %vm1936_vm8 = vcmp.eq.f32.partialorder %v940_v33, 8.507059e+37 }
  0xc6   : > { %v1548_v15 = vpop.eup %1547  ;;  %1555 = vrcp.f32 %v1925_v21  ;;  %v1941_v14 = vadd.f32 1.0, %v1546_v42  ;;  %1102 = vperm.xlu2 %1482, %v734_v45   ;;  %v943_v49 = vor.u32 1.1754944e-38, %v942_v34  ;;  %v1444_v50 = vmul.f32 -1.442695, %v470_v39 }
  0xc7   : > { %v1550_v51 = vpop.eup %1549  ;;  %v1943_v52 = vadd.f32 1.0, %v1548_v15  ;;  %v935_v55 = vadd.f32 %v1858_v43, %v934_v46  ;;  %v618_v53 = vsub.f32 1.0, %v617_v41  ;;  %vm621_vm9 = vweird.f32 %v1769_v35 }
  0xc8   : > { %v1948_v61 = vpop.eup %1551  ;;  %1557 = vrcp.f32 %v1941_v14  ;;  %v1951_v62 = vadd.f32 1.0, %v1550_v51  ;;  %vm622_vm11 = vweird.f32 %v1816_v9  ;;  %v625_v0 = vand.u32 2147483647, %v1769_v35 }
  0xc9   : > { %1559 = vrcp.f32 %v1943_v52  ;;  %v939_v19 = vsel %vm938_vm10, %v1858_v43, %v935_v55  ;;  %v619_v5 = vmul.f32 %v1816_v9, %v618_v53  ;;  %v627_v7 = vand.u32 2147483648, %v1769_v35  ;;  %vm623_vm13 = vmor %vm621_vm9, %vm622_vm11 }
  0xca   : > { %1561 = vrcp.f32 %v1951_v62  ;;  %v944_v4 = vsel %vm1936_vm8, %v943_v49, %v939_v19  ;;  %vm1968_vm12 = vcmp.eq.f32.partialorder %v625_v0, 8.507059e+37  ;;  %v431_v11 = vadd.f32 %v430_v60, %v288_v58  ;;  %v307_v0 = vld [vmem:[%s1717_s8 + $0xc8] sm:$0xff] }
  0xcb   : > { %v1972_v16 = vpop.eup %1553  ;;  %1172 = vperm.xlu1 %1481, %v944_v4   ;;  %1563 = vpow2.f32 %v1444_v50  ;;  %v620_v43 = vadd.f32 %v1816_v9, %v619_v5  ;;  %v628_v17 = vor.u32 1.1754944e-38, %v627_v7  ;;  %v452_v20 = vadd.f32 %v451_v3, %v295_v1  ;;  %v487_v1 = vpop.f32.mrf.mxu3 }
  0xcc   : > { %v1975_v23 = vpop.eup %1555  ;;  %v1431_v59 = vmul.f32 -1.442695, %v431_v11  ;;  %v485_v24 = vadd.f32 %v484_v57, %v306_v8  ;;  %v947_v25 = vmul.f32 %v1896_v12, %v1849_v38  ;;  %vm951_vm14 = vweird.f32 %v1849_v38 }
  0xcd   : > { %v624_v40 = vsel %vm623_vm13, %v1816_v9, %v620_v43  ;;  %v1438_v26 = vmul.f32 -1.442695, %v452_v20  ;;  %vm952_vm15 = vweird.f32 %v1896_v12  ;;  %v955_v27 = vand.u32 2147483647, %v1849_v38 }
  0xce   : > { %v1987_v22 = vpop.eup %1557  ;;  %v629_v35 = vsel %vm1968_vm12, %v628_v17, %v624_v40  ;;  %1565 = vpow2.f32 %v1431_v59  ;;  %v1449_v32 = vmul.f32 -1.442695, %v485_v24  ;;  %v948_v33 = vsub.f32 1.0, %v947_v25  ;;  %vm2009_vm3 = vmor %vm951_vm14, %vm952_vm15 }
  0xcf   : > { %v1991_v34 = vpop.eup %1559  ;;  %1067 = vperm.xlu0 %1480, %v629_v35   ;;  %1567 = vpow2.f32 %v1438_v26  ;;  %vm1993_vm0 = vcmp.eq.f32.partialorder %v955_v27, 8.507059e+37  ;;  %v957_v9 = vand.u32 2147483648, %v1849_v38  ;;  %v632_v39 = vmul.f32 %v1865_v48, %v1818_v10 }
  0xd0   : > { %v2000_v41 = vpop.eup %1561  ;;  %1569 = vpow2.f32 %v1449_v32  ;;  %v949_v42 = vmul.f32 %v1896_v12, %v948_v33  ;;  %vm636_vm1 = vweird.f32 %v1818_v10  ;;  %vm637_vm2 = vweird.f32 %v1865_v48 }
  0xd1   : > { %v1564_v45 = vpop.eup %1563  ;;  %v958_v47 = vor.u32 1.1754944e-38, %v957_v9  ;;  %v633_v15 = vsub.f32 1.0, %v632_v39  ;;  %v640_v49 = vand.u32 2147483647, %v1818_v10  ;;  %v642_v50 = vand.u32 2147483648, %v1818_v10  ;;  %vm638_vm7 = vmor %vm636_vm1, %vm637_vm2  ;;  %v302_v9 = vld [vmem:[%s1717_s8 + $0xa0] sm:$0xff]  ;;  %v472_v39 = vpop.f32.mrf.mxu2 }
  0xd2   : > { %v2015_v51 = vadd.f32 1.0, %v1564_v45  ;;  %v950_v55 = vadd.f32 %v1896_v12, %v949_v42  ;;  %v827_v53 = vmul.f32 %v1840_v30, %v1784_v54  ;;  %vm831_vm4 = vweird.f32 %v1784_v54 }
  0xd3   : > { %v634_v38 = vmul.f32 %v1865_v48, %v633_v15  ;;  %vm2022_vm5 = vcmp.eq.f32.partialorder %v640_v49, 8.507059e+37  ;;  %v643_v60 = vor.u32 1.1754944e-38, %v642_v50  ;;  %vm832_vm6 = vweird.f32 %v1840_v30 }
  0xd4   : > { %v1566_v3 = vpop.eup %1565  ;;  %1571 = vrcp.f32 %v2015_v51  ;;  %v954_v19 = vsel %vm2009_vm3, %v1896_v12, %v950_v55  ;;  %v828_v5 = vsub.f32 1.0, %v827_v53  ;;  %v835_v7 = vand.u32 2147483647, %v1784_v54  ;;  %vm833_vm9 = vmor %vm831_vm4, %vm832_vm6 }
  0xd5   : > { %v1568_v8 = vpop.eup %1567  ;;  %v2033_v57 = vadd.f32 1.0, %v1566_v3  ;;  %v959_v4 = vsel %vm1993_vm0, %v958_v47, %v954_v19  ;;  %v635_v56 = vadd.f32 %v1865_v48, %v634_v38  ;;  %v837_v11 = vand.u32 2147483648, %v1784_v54 }
  0xd6   : > { %v1570_v43 = vpop.eup %1569  ;;  %v2039_v17 = vadd.f32 1.0, %v1568_v8  ;;  %1177 = vperm.xlu2 %1482, %v959_v4   ;;  %v829_v12 = vmul.f32 %v1840_v30, %v828_v5  ;;  %vm2046_vm8 = vcmp.eq.f32.partialorder %v835_v7, 8.507059e+37  ;;  %v488_v59 = vadd.f32 %v487_v1, %v307_v0 }
  0xd7   : > { %1573 = vrcp.f32 %v2033_v57  ;;  %v2051_v24 = vadd.f32 1.0, %v1570_v43  ;;  %v639_v25 = vsel %vm638_vm7, %v1865_v48, %v635_v56  ;;  %v838_v40 = vor.u32 1.1754944e-38, %v837_v11 }
  0xd8   : > { %1575 = vrcp.f32 %v2039_v17  ;;  %v644_v10 = vsel %vm2022_vm5, %v643_v60, %v639_v25  ;;  %v830_v26 = vadd.f32 %v1840_v30, %v829_v12  ;;  %v1450_v27 = vmul.f32 -1.442695, %v488_v59 }
  0xd9   : > { %1577 = vrcp.f32 %v2051_v24  ;;  %1072 = vperm.xlu1 %1481, %v644_v10   ;;  %v857_v48 = vmul.f32 %v1948_v61, %v1898_v13  ;;  %vm861_vm10 = vweird.f32 %v1898_v13  ;;  %vm862_vm11 = vweird.f32 %v1948_v61 }
  0xda   : > { %v2067_v35 = vpop.eup %1571  ;;  %v834_v32 = vsel %vm833_vm9, %v1840_v30, %v830_v26  ;;  %1579 = vpow2.f32 %v1450_v27  ;;  %v865_v33 = vand.u32 2147483647, %v1898_v13  ;;  %v867_v37 = vand.u32 2147483648, %v1898_v13  ;;  %vm863_vm2 = vmor %vm861_vm10, %vm862_vm11 }
  0xdb   : > { %v839_v54 = vsel %vm2046_vm8, %v838_v40, %v834_v32  ;;  %v858_v42 = vsub.f32 1.0, %v857_v48  ;;  %v842_v45 = vmul.f32 %v1890_v6, %v1842_v31  ;;  %vm846_vm12 = vweird.f32 %v1842_v31 }
  0xdc   : > { %1137 = vperm.xlu0 %1480, %v839_v54   ;;  %vm2078_vm13 = vcmp.eq.f32.partialorder %v865_v33, 8.507059e+37  ;;  %v868_v30 = vor.u32 1.1754944e-38, %v867_v37  ;;  %vm847_vm14 = vweird.f32 %v1890_v6  ;;  %v850_v47 = vand.u32 2147483647, %v1842_v31  ;;  %v308_v33 = vld [vmem:[%s1717_s8 + $0xd0] sm:$0xff]  ;;  %v490_v37 = vpop.f32.mrf.mxu3 }
  0xdd   : > { %v2084_v15 = vpop.eup %1573  ;;  %v859_v49 = vmul.f32 %v1948_v61, %v858_v42  ;;  %v843_v50 = vsub.f32 1.0, %v842_v45  ;;  %v852_v55 = vand.u32 2147483648, %v1842_v31  ;;  %v473_v53 = vadd.f32 %v472_v39, %v302_v9  ;;  %vm848_vm3 = vmor %vm846_vm12, %vm847_vm14 }
  0xde   : > { %v2088_v38 = vpop.eup %1575  ;;  %vm2090_vm15 = vcmp.eq.f32.partialorder %v850_v47, 8.507059e+37  ;;  %v737_v60 = vmul.f32 %v1886_v2, %v1837_v28  ;;  %vm741_vm0 = vweird.f32 %v1837_v28  ;;  %vm742_vm1 = vweird.f32 %v1886_v2 }
  0xdf   : > { %v2098_v0 = vpop.eup %1577  ;;  %v860_v1 = vadd.f32 %v1948_v61, %v859_v49  ;;  %v844_v3 = vmul.f32 %v1890_v6, %v843_v50  ;;  %v853_v19 = vor.u32 1.1754944e-38, %v852_v55  ;;  %v1445_v5 = vmul.f32 -1.442695, %v473_v53  ;;  %vm2131_vm5 = vmor %vm741_vm0, %vm742_vm1 }
  0xe0   : > { %v1580_v7 = vpop.eup %1579  ;;  %v738_v8 = vsub.f32 1.0, %v737_v60  ;;  %v745_v4 = vand.u32 2147483647, %v1837_v28  ;;  %v747_v56 = vand.u32 2147483648, %v1837_v28  ;;  %v662_v11 = vmul.f32 %v1972_v16, %v1919_v29 }
  0xe1   : > { %v2110_v43 = vadd.f32 1.0, %v1580_v7  ;;  %v864_v12 = vsel %vm863_vm2, %v1948_v61, %v860_v1  ;;  %v845_v20 = vadd.f32 %v1890_v6, %v844_v3  ;;  %1581 = vpow2.f32 %v1445_v5 }
  0xe2   : > { %v869_v59 = vsel %vm2078_vm13, %v868_v30, %v864_v12  ;;  %v739_v13 = vmul.f32 %v1886_v2, %v738_v8  ;;  %vm2121_vm4 = vcmp.eq.f32.partialorder %v745_v4, 8.507059e+37  ;;  %v748_v40 = vor.u32 1.1754944e-38, %v747_v56 }
  0xe3   : > { %1583 = vrcp.f32 %v2110_v43  ;;  %1147 = vperm.xlu2 %1482, %v869_v59   ;;  %v849_v61 = vsel %vm848_vm3, %v1890_v6, %v845_v20  ;;  %v663_v10 = vsub.f32 1.0, %v662_v11  ;;  %vm666_vm6 = vweird.f32 %v1919_v29 }
  0xe4   : > { %v854_v26 = vsel %vm2090_vm15, %v853_v19, %v849_v61  ;;  %v740_v27 = vadd.f32 %v1886_v2, %v739_v13  ;;  %vm667_vm7 = vweird.f32 %v1972_v16  ;;  %v670_v6 = vand.u32 2147483647, %v1919_v29 }
  0xe5   : > { %1142 = vperm.xlu1 %1481, %v854_v26   ;;  %v664_v48 = vmul.f32 %v1972_v16, %v663_v10  ;;  %v672_v28 = vand.u32 2147483648, %v1919_v29  ;;  %v647_v32 = vmul.f32 %v1902_v18, %v1860_v44  ;;  %vm651_vm8 = vweird.f32 %v1860_v44  ;;  %vm2150_vm9 = vmor %vm666_vm6, %vm667_vm7 }
  0xe6   : > { %v744_v9 = vsel %vm2131_vm5, %v1886_v2, %v740_v27  ;;  %vm2154_vm10 = vcmp.eq.f32.partialorder %v670_v6, 8.507059e+37  ;;  %vm652_vm11 = vweird.f32 %v1902_v18  ;;  %v655_v29 = vand.u32 2147483647, %v1860_v44 }
  0xe7   : > { %v1582_v42 = vpop.eup %1581  ;;  %v749_v45 = vsel %vm2121_vm4, %v748_v40, %v744_v9  ;;  %v665_v46 = vadd.f32 %v1972_v16, %v664_v48  ;;  %v673_v30 = vor.u32 1.1754944e-38, %v672_v28  ;;  %v648_v2 = vsub.f32 1.0, %v647_v32  ;;  %vm2186_vm14 = vmor %vm651_vm8, %vm652_vm11 }
  0xe8   : > { %v2163_v47 = vadd.f32 1.0, %v1582_v42  ;;  %1107 = vperm.xlu0 %1480, %v749_v45   ;;  %vm2165_vm12 = vcmp.eq.f32.partialorder %v655_v29, 8.507059e+37  ;;  %v657_v50 = vand.u32 2147483648, %v1860_v44  ;;  %v491_v55 = vadd.f32 %v490_v37, %v308_v33 }
  0xe9   : > { %v2170_v53 = vpop.eup %1583  ;;  %v669_v58 = vsel %vm2150_vm9, %v1972_v16, %v665_v46  ;;  %v649_v60 = vmul.f32 %v1902_v18, %v648_v2  ;;  %v872_v1 = vmul.f32 %v1987_v22, %v1941_v14  ;;  %vm876_vm13 = vweird.f32 %v1941_v14  ;;  %v1053_v46 = vld [vmem:[%s2445_s12 + $0x178] sm:$0xff] }
  0xea   : > { %1585 = vrcp.f32 %v2163_v47  ;;  %v674_v3 = vsel %vm2154_vm10, %v673_v30, %v669_v58  ;;  %v658_v16 = vor.u32 1.1754944e-38, %v657_v50  ;;  %v1451_v5 = vmul.f32 -1.442695, %v491_v55 }
  0xeb   : > { %1082 = vperm.xlu2 %1482, %v674_v3   ;;  %v650_v7 = vadd.f32 %v1902_v18, %v649_v60  ;;  %v873_v8 = vsub.f32 1.0, %v872_v1  ;;  %vm877_vm15 = vweird.f32 %v1987_v22  ;;  %v880_v4 = vand.u32 2147483647, %v1941_v14 }
  0xec   : > { %1587 = vpow2.f32 %v1451_v5  ;;  %v882_v56 = vand.u32 2147483648, %v1941_v14  ;;  %v767_v44 = vmul.f32 %v1975_v23, %v1925_v21  ;;  %vm771_vm0 = vweird.f32 %v1925_v21  ;;  %vm878_vm4 = vmor %vm876_vm13, %vm877_vm15 }
  0xed   : > { %v654_v11 = vsel %vm2186_vm14, %v1902_v18, %v650_v7  ;;  %v874_v12 = vmul.f32 %v1987_v22, %v873_v8  ;;  %vm2201_vm1 = vcmp.eq.f32.partialorder %v880_v4, 8.507059e+37  ;;  %vm772_vm2 = vweird.f32 %v1975_v23 }
  0xee   : > { %v659_v59 = vsel %vm2165_vm12, %v658_v16, %v654_v11  ;;  %v883_v13 = vor.u32 1.1754944e-38, %v882_v56  ;;  %v768_v25 = vsub.f32 1.0, %v767_v44  ;;  %v775_v40 = vand.u32 2147483647, %v1925_v21  ;;  %vm2232_vm7 = vmor %vm771_vm0, %vm772_vm2 }
  0xef   : > { %1077 = vperm.xlu1 %1481, %v659_v59   ;;  %v875_v61 = vadd.f32 %v1987_v22, %v874_v12  ;;  %v777_v18 = vand.u32 2147483648, %v1925_v21  ;;  %v752_v31 = vmul.f32 %v1923_v36, %v1883_v63  ;;  %vm756_vm3 = vweird.f32 %v1883_v63 }
  0xf0   : > { %v2214_v10 = vpop.eup %1585  ;;  %v769_v26 = vmul.f32 %v1975_v23, %v768_v25  ;;  %vm2221_vm5 = vcmp.eq.f32.partialorder %v775_v40, 8.507059e+37  ;;  %vm757_vm6 = vweird.f32 %v1923_v36  ;;  %v760_v6 = vand.u32 2147483647, %v1883_v63 }
  0xf1   : > { %v879_v48 = vsel %vm878_vm4, %v1987_v22, %v875_v61  ;;  %v778_v14 = vor.u32 1.1754944e-38, %v777_v18  ;;  %v753_v32 = vsub.f32 1.0, %v752_v31  ;;  %v762_v33 = vand.u32 2147483648, %v1883_v63  ;;  %vm2257_vm10 = vmor %vm756_vm3, %vm757_vm6 }
  0xf2   : > { %v1588_v37 = vpop.eup %1587  ;;  %v884_v9 = vsel %vm2201_vm1, %v883_v13, %v879_v48  ;;  %v770_v39 = vadd.f32 %v1975_v23, %v769_v26  ;;  %vm2240_vm8 = vcmp.eq.f32.partialorder %v760_v6, 8.507059e+37  ;;  %v782_v21 = vmul.f32 %v2000_v41, %v1951_v62 }
  0xf3   : > { %v2246_v54 = vadd.f32 1.0, %v1588_v37  ;;  %1152 = vperm.xlu0 %1480, %v884_v9   ;;  %v754_v29 = vmul.f32 %v1923_v36, %v753_v32  ;;  %v763_v42 = vor.u32 1.1754944e-38, %v762_v33  ;;  %vm786_vm9 = vweird.f32 %v1951_v62 }
  0xf4   : > { %v774_v45 = vsel %vm2232_vm7, %v1975_v23, %v770_v39  ;;  %v783_v30 = vsub.f32 1.0, %v782_v21  ;;  %vm787_vm11 = vweird.f32 %v2000_v41  ;;  %v790_v2 = vand.u32 2147483647, %v1951_v62 }
  0xf5   : > { %1589 = vrcp.f32 %v2246_v54  ;;  %v779_v49 = vsel %vm2221_vm5, %v778_v14, %v774_v45  ;;  %v755_v23 = vadd.f32 %v1923_v36, %v754_v29  ;;  %v792_v50 = vand.u32 2147483648, %v1951_v62  ;;  %vm2281_vm14 = vmor %vm786_vm9, %vm787_vm11 }
  0xf6   : > { %1117 = vperm.xlu2 %1482, %v779_v49   ;;  %v784_v63 = vmul.f32 %v2000_v41, %v783_v30  ;;  %vm2269_vm12 = vcmp.eq.f32.partialorder %v790_v2, 8.507059e+37  ;;  %v677_v58 = vmul.f32 %v1991_v34, %v1943_v52  ;;  %vm681_vm13 = vweird.f32 %v1943_v52 }
  0xf7   : > { %v759_v60 = vsel %vm2257_vm10, %v1923_v36, %v755_v23  ;;  %v793_v3 = vor.u32 1.1754944e-38, %v792_v50  ;;  %vm682_vm15 = vweird.f32 %v1991_v34  ;;  %v685_v19 = vand.u32 2147483647, %v1943_v52 }
  0xf8   : > { %v764_v16 = vsel %vm2240_vm8, %v763_v42, %v759_v60  ;;  %v785_v5 = vadd.f32 %v2000_v41, %v784_v63  ;;  %v678_v7 = vsub.f32 1.0, %v677_v58  ;;  %v687_v8 = vand.u32 2147483648, %v1943_v52  ;;  %vm2312_vm3 = vmor %vm681_vm13, %vm682_vm15  ;;  %v1041_v58 = vld [vmem:[%s2445_s12 + $0x118] sm:$0xff] }
  0xf9   : > { %1112 = vperm.xlu1 %1481, %v764_v16   ;;  %vm2291_vm0 = vcmp.eq.f32.partialorder %v685_v19, 8.507059e+37  ;;  %v887_v62 = vmul.f32 %v2067_v35, %v2015_v51  ;;  %vm891_vm1 = vweird.f32 %v2015_v51  ;;  %vm892_vm2 = vweird.f32 %v2067_v35 }
  0xfa   : > { %v789_v4 = vsel %vm2281_vm14, %v2000_v41, %v785_v5  ;;  %v679_v56 = vmul.f32 %v1991_v34, %v678_v7  ;;  %v688_v44 = vor.u32 1.1754944e-38, %v687_v8  ;;  %v895_v11 = vand.u32 2147483647, %v2015_v51  ;;  %vm893_vm8 = vmor %vm891_vm1, %vm892_vm2 }
  0xfb   : > { %v2304_v12 = vpop.eup %1589  ;;  %v794_v20 = vsel %vm2269_vm12, %v793_v3, %v789_v4  ;;  %v888_v13 = vsub.f32 1.0, %v887_v62  ;;  %v897_v41 = vand.u32 2147483648, %v2015_v51  ;;  %v692_v25 = vmul.f32 %v2084_v15, %v2033_v57 }
  0xfc   : > { %1122 = vperm.xlu0 %1480, %v794_v20   ;;  %v680_v40 = vadd.f32 %v1991_v34, %v679_v56  ;;  %vm2320_vm4 = vcmp.eq.f32.partialorder %v895_v11, 8.507059e+37  ;;  %vm696_vm5 = vweird.f32 %v2033_v57  ;;  %vm697_vm6 = vweird.f32 %v2084_v15 }
  0xfd   : > { %v889_v52 = vmul.f32 %v2067_v35, %v888_v13  ;;  %v898_v18 = vor.u32 1.1754944e-38, %v897_v41  ;;  %v693_v31 = vsub.f32 1.0, %v692_v25  ;;  %v700_v26 = vand.u32 2147483647, %v2033_v57  ;;  %vm2351_vm10 = vmor %vm696_vm5, %vm697_vm6 }
  0xfe   : > { %v684_v27 = vsel %vm2312_vm3, %v1991_v34, %v680_v40  ;;  %v702_v6 = vand.u32 2147483648, %v2033_v57  ;;  %v902_v48 = vmul.f32 %v2214_v10, %v2163_v47  ;;  %vm906_vm7 = vweird.f32 %v2163_v47 }
  0xff   : > { %v689_v28 = vsel %vm2291_vm0, %v688_v44, %v684_v27  ;;  %v890_v14 = vadd.f32 %v2067_v35, %v889_v52  ;;  %v694_v32 = vmul.f32 %v2084_v15, %v693_v31  ;;  %vm2343_vm9 = vcmp.eq.f32.partialorder %v700_v26, 8.507059e+37  ;;  %v1034_v27 = vld [vmem:[%s2445_s12 + $0xe0] sm:$0xff] }
 0x100   : > { %1087 = vperm.xlu2 %1482, %v689_v28   ;;  %v703_v37 = vor.u32 1.1754944e-38, %v702_v6  ;;  %v903_v9 = vsub.f32 1.0, %v902_v48  ;;  %vm907_vm11 = vweird.f32 %v2214_v10  ;;  %v910_v51 = vand.u32 2147483647, %v2163_v47  ;;  %v1035_v6 = vld [vmem:[%s2445_s12 + $0xe8] sm:$0xff]  ;;  %v1022_v28 = vld [vmem:[%s2445_s12 + $0x80] sm:$0xff] }
 0x101   : > { %v894_v39 = vsel %vm893_vm8, %v2067_v35, %v890_v14  ;;  %v695_v22 = vadd.f32 %v2084_v15, %v694_v32  ;;  %v912_v21 = vand.u32 2147483648, %v2163_v47  ;;  %v797_v29 = vmul.f32 %v2088_v38, %v2039_v17  ;;  %vm2375_vm14 = vmor %vm906_vm7, %vm907_vm11  ;;  %v1023_v14 = vld [vmem:[%s2445_s12 + $0x88] sm:$0xff] }
 0x102   : > { %v899_v57 = vsel %vm2320_vm4, %v898_v18, %v894_v39  ;;  %v904_v42 = vmul.f32 %v2214_v10, %v903_v9  ;;  %vm2365_vm12 = vcmp.eq.f32.partialorder %v910_v51, 8.507059e+37  ;;  %vm801_vm13 = vweird.f32 %v2039_v17  ;;  %v1007_v9 = vld [vmem:[%s2445_s12 + $0x8] sm:$0xff]  ;;  %v1020_v51 = vld [vmem:[%s2445_s12 + $0x70] sm:$0xff]  ;;  %v1021_v39 = vld [vmem:[%s2445_s12 + $0x78] sm:$0xff] }
 0x103   : > { %1157 = vperm.xlu1 %1481, %v899_v57   ;;  %v699_v35 = vsel %vm2351_vm10, %v2084_v15, %v695_v22  ;;  %v913_v30 = vor.u32 1.1754944e-38, %v912_v21  ;;  %v798_v2 = vsub.f32 1.0, %v797_v29  ;;  %vm802_vm15 = vweird.f32 %v2088_v38 }
 0x104   : > { %v704_v49 = vsel %vm2343_vm9, %v703_v37, %v699_v35  ;;  %v905_v23 = vadd.f32 %v2214_v10, %v904_v42  ;;  %v805_v50 = vand.u32 2147483647, %v2039_v17  ;;  %v807_v63 = vand.u32 2147483648, %v2039_v17  ;;  %vm2395_vm2 = vmor %vm801_vm13, %vm802_vm15  ;;  %v1006_v37 = vld [vmem:[%s2445_s12] sm:$0xff]  ;;  %v1052_v35 = vld [vmem:[%s2445_s12 + $0x170] sm:$0xff] }
 0x105   : > { %1092 = vperm.xlu0 %1480, %v704_v49   ;;  %v799_v15 = vmul.f32 %v2088_v38, %v798_v2  ;;  %v962_v47 = vmul.f32 %v2098_v0, %v2051_v24  ;;  %vm966_vm0 = vweird.f32 %v2051_v24  ;;  %vm967_vm1 = vweird.f32 %v2098_v0  ;;  %v1049_v2 = vld [vmem:[%s2445_s12 + $0x158] sm:$0xff] }
 0x106   : > { %v909_v55 = vsel %vm2375_vm14, %v2214_v10, %v905_v23  ;;  %vm806_vm3 = vcmp.eq.f32.partialorder %v805_v50, 8.507059e+37  ;;  %v808_v60 = vor.u32 1.1754944e-38, %v807_v63  ;;  %v970_v1 = vand.u32 2147483647, %v2051_v24  ;;  %vm2417_vm6 = vmor %vm966_vm0, %vm967_vm1 }
 0x107   : > { %v914_v3 = vsel %vm2365_vm12, %v913_v30, %v909_v55  ;;  %v800_v19 = vadd.f32 %v2088_v38, %v799_v15  ;;  %v963_v16 = vsub.f32 1.0, %v962_v47  ;;  %v972_v5 = vand.u32 2147483648, %v2051_v24  ;;  %v1048_v30 = vld [vmem:[%s2445_s12 + $0x150] sm:$0xff] }
 0x108   : > { %1162 = vperm.xlu2 %1482, %v914_v3   ;;  %v992_v17 = vmul.f32 %v2304_v12, %v2246_v54  ;;  %vm996_vm4 = vweird.f32 %v2246_v54  ;;  %vm997_vm5 = vweird.f32 %v2304_v12  ;;  %v1000_v36 = vand.u32 2147483647, %v2246_v54  ;;  %v1040_v55 = vld [vmem:[%s2445_s12 + $0x110] sm:$0xff] }
 0x109   : > { %v804_v10 = vsel %vm2395_vm2, %v2088_v38, %v800_v19  ;;  %v964_v7 = vmul.f32 %v2098_v0, %v963_v16  ;;  %v973_v8 = vor.u32 1.1754944e-38, %v972_v5  ;;  %v1002_v44 = vand.u32 2147483648, %v2246_v54  ;;  %vm998_vm10 = vmor %vm996_vm4, %vm997_vm5 }
 0x10a   : > { %v809_v62 = vsel %vm806_vm3, %v808_v60, %v804_v10  ;;  %v993_v56 = vsub.f32 1.0, %v992_v17  ;;  %v977_v38 = vmul.f32 %v2170_v53, %v2110_v43  ;;  %vm971_vm7 = vcmp.eq.f32.partialorder %v970_v1, 8.507059e+37  ;;  %v1050_v60 = vld [vmem:[%s2445_s12 + $0x160] sm:$0xff]  ;;  %v1051_v1 = vld [vmem:[%s2445_s12 + $0x168] sm:$0xff] }
 0x10b   : > { %1127 = vperm.xlu1 %1481, %v809_v62   ;;  %v965_v11 = vadd.f32 %v2098_v0, %v964_v7  ;;  %vm981_vm8 = vweird.f32 %v2110_v43  ;;  %vm982_vm9 = vweird.f32 %v2170_v53  ;;  %v985_v24 = vand.u32 2147483647, %v2110_v43  ;;  %v1008_v7 = vld [vmem:[%s2445_s12 + $0x10] sm:$0xff] }
 0x10c   : > { %v994_v20 = vmul.f32 %v2304_v12, %v993_v56  ;;  %v978_v59 = vsub.f32 1.0, %v977_v38  ;;  %v1003_v41 = vor.u32 1.1754944e-38, %v1002_v44  ;;  %v987_v25 = vand.u32 2147483648, %v2110_v43  ;;  %vm983_vm12 = vmor %vm981_vm8, %vm982_vm9  ;;  %v1014_v56 = vld [vmem:[%s2445_s12 + $0x40] sm:$0xff]  ;;  %v1015_v44 = vld [vmem:[%s2445_s12 + $0x48] sm:$0xff] }
 0x10d   : > { %v969_v13 = vsel %vm2417_vm6, %v2098_v0, %v965_v11  ;;  %vm1001_vm11 = vcmp.eq.f32.partialorder %v1000_v36, 8.507059e+37  ;;  %vm986_vm13 = vcmp.eq.f32.partialorder %v985_v24, 8.507059e+37  ;;  %vm1250_vm14 = vcmask 556032   ;;  %v1011_v24 = vld [vmem:[%s2445_s12 + $0x28] sm:$0xff] }
 0x10e   : > { %v974_v40 = vsel %vm971_vm7, %v973_v8, %v969_v13  ;;  %v995_v61 = vadd.f32 %v2304_v12, %v994_v20  ;;  %v979_v52 = vmul.f32 %v2170_v53, %v978_v59  ;;  %v988_v18 = vor.u32 1.1754944e-38, %v987_v25  ;;  %v1009_v8 = vld [vmem:[%s2445_s12 + $0x18] sm:$0xff]  ;;  %v1010_v59 = vld [vmem:[%s2445_s12 + $0x20] sm:$0xff] }
 0x10f   : > { %1182 = vperm.xlu0 %1480, %v974_v40   ;;  %v1036_v40 = vld [vmem:[%s2445_s12 + $0xf0] sm:$0xff] }
 0x110   : > { %v999_v0 = vsel %vm998_vm10, %v2304_v12, %v995_v61  ;;  %v980_v54 = vadd.f32 %v2170_v53, %v979_v52  ;;  %v1037_v61 = vld [vmem:[%s2445_s12 + $0xf8] sm:$0xff]  ;;  %v1028_v52 = vld [vmem:[%s2445_s12 + $0xb0] sm:$0xff] }
 0x111   : > { %v1004_v31 = vsel %vm1001_vm11, %v1003_v41, %v999_v0 }
 0x112   : > { %1192 = vperm.xlu2 %1482, %v1004_v31   ;;  %v984_v43 = vsel %vm983_vm12, %v2170_v53, %v980_v54 }
 0x113   : > { %v989_v26 = vsel %vm986_vm13, %v988_v18, %v984_v43  ;;  %v1029_v18 = vld [vmem:[%s2445_s12 + $0xb8] sm:$0xff] }
 0x114   : > { %1187 = vperm.xlu1 %1481, %v989_v26  }
 0x115   : > { %v1133_v12 = vpop.permute.xlu2 %1132 }
 0x116   : > { %v1223_v53 = vmul.f32 %v1133_v12, %v1034_v27  ;;  %v1224_v48 = vmul.f32 %v1133_v12, %v1035_v6  ;;  %v1038_v6 = vld [vmem:[%s2445_s12 + $0x100] sm:$0xff]  ;;  %v1039_v12 = vld [vmem:[%s2445_s12 + $0x108] sm:$0xff] }
 0x118   : > { %1278 = vst [vmem:[%s2455_s16 + $0xe0] sm:$0xff] %v1223_v53 }
 0x119   : > { %1279 = vst.msk [vmem:[%s2455_s16 + $0xe8] sm:$0xff] %vm1250_vm14, %v1224_v48  ;;  %v1016_v48 = vld [vmem:[%s2445_s12 + $0x50] sm:$0xff] }
 0x120   : > { %v1103_v32 = vpop.permute.xlu2 %1102 }
 0x121   : > { %v1211_v34 = vmul.f32 %v1103_v32, %v1022_v28  ;;  %v1212_v33 = vmul.f32 %v1103_v32, %v1023_v14  ;;  %v1017_v28 = vld [vmem:[%s2445_s12 + $0x58] sm:$0xff] }
 0x123   : > { %1266 = vst [vmem:[%s2455_s16 + $0x80] sm:$0xff] %v1211_v34  ;;  %v1024_v34 = vld [vmem:[%s2445_s12 + $0x90] sm:$0xff] }
 0x124   : > { %1267 = vst.msk [vmem:[%s2455_s16 + $0x88] sm:$0xff] %vm1250_vm14, %v1212_v33  ;;  %v1025_v33 = vld [vmem:[%s2445_s12 + $0x98] sm:$0xff] }
 0x125   : > { %v1063_v22 = vpop.permute.xlu0 %1062 }
 0x126   : > { %v1195_v21 = vmul.f32 %v1063_v22, %v1006_v37  ;;  %v1196_v29 = vmul.f32 %v1063_v22, %v1007_v9 }
 0x127   : > { %v1098_v57 = vpop.permute.xlu1 %1097 }
 0x128   : > { %v1209_v42 = vmul.f32 %v1098_v57, %v1020_v51  ;;  %v1210_v45 = vmul.f32 %v1098_v57, %v1021_v39  ;;  %1249 = vst [vmem:[%s2455_s16] sm:$0xff] %v1195_v21  ;;  %v1046_v57 = vld [vmem:[%s2445_s12 + $0x140] sm:$0xff] }
 0x129   : > { %1251 = vst.msk [vmem:[%s2455_s16 + $0x8] sm:$0xff] %vm1250_vm14, %v1196_v29  ;;  %v1012_v29 = vld [vmem:[%s2445_s12 + $0x30] sm:$0xff] }
 0x12a   : > { %1264 = vst [vmem:[%s2455_s16 + $0x70] sm:$0xff] %v1209_v42  ;;  %v1047_v42 = vld [vmem:[%s2445_s12 + $0x148] sm:$0xff] }
 0x12b   : > { %1265 = vst.msk [vmem:[%s2455_s16 + $0x78] sm:$0xff] %vm1250_vm14, %v1210_v45  ;;  %v1013_v45 = vld [vmem:[%s2445_s12 + $0x38] sm:$0xff] }
 0x130   : > { %v1178_v49 = vpop.permute.xlu2 %1177  ;;  %v1168_v23 = vpop.permute.xlu0 %1167 }
 0x131   : > { %v1241_v50 = vmul.f32 %v1178_v49, %v1052_v35  ;;  %v1242_v63 = vmul.f32 %v1178_v49, %v1053_v46  ;;  %v1237_v15 = vmul.f32 %v1168_v23, %v1048_v30  ;;  %v1238_v47 = vmul.f32 %v1168_v23, %v1049_v2 }
 0x133   : > { %1296 = vst [vmem:[%s2455_s16 + $0x170] sm:$0xff] %v1241_v50  ;;  %v1042_v50 = vld [vmem:[%s2445_s12 + $0x120] sm:$0xff] }
 0x134   : > { %1297 = vst.msk [vmem:[%s2455_s16 + $0x178] sm:$0xff] %vm1250_vm14, %v1242_v63  ;;  %v1043_v63 = vld [vmem:[%s2445_s12 + $0x128] sm:$0xff] }
 0x135   : > { %1292 = vst [vmem:[%s2455_s16 + $0x150] sm:$0xff] %v1237_v15 }
 0x136   : > { %1293 = vst.msk [vmem:[%s2455_s16 + $0x158] sm:$0xff] %vm1250_vm14, %v1238_v47 }
 0x13d   : > { %v1148_v3 = vpop.permute.xlu2 %1147  ;;  %v1173_v19 = vpop.permute.xlu1 %1172 }
 0x13e   : > { %v1229_v16 = vmul.f32 %v1148_v3, %v1040_v55  ;;  %v1230_v5 = vmul.f32 %v1148_v3, %v1041_v58  ;;  %v1239_v17 = vmul.f32 %v1173_v19, %v1050_v60  ;;  %v1240_v10 = vmul.f32 %v1173_v19, %v1051_v1  ;;  %v1026_v58 = vld [vmem:[%s2445_s12 + $0xa0] sm:$0xff]  ;;  %v1059_v1 = vld [vmem:[%s2445_s12 + $0x1a8] sm:$0xff] }
 0x13f   : > { %v1058_v60 = vld [vmem:[%s2445_s12 + $0x1a0] sm:$0xff]  ;;  %v1027_v3 = vld [vmem:[%s2445_s12 + $0xa8] sm:$0xff] }
 0x140   : > { %1284 = vst [vmem:[%s2455_s16 + $0x110] sm:$0xff] %v1229_v16 }
 0x141   : > { %1285 = vst.msk [vmem:[%s2455_s16 + $0x118] sm:$0xff] %vm1250_vm14, %v1230_v5  ;;  %v1068_v36 = vpop.permute.xlu0 %1067 }
 0x142   : > { %1294 = vst [vmem:[%s2455_s16 + $0x160] sm:$0xff] %v1239_v17  ;;  %v1197_v62 = vmul.f32 %v1068_v36, %v1008_v7  ;;  %v1198_v4 = vmul.f32 %v1068_v36, %v1009_v8  ;;  %v1030_v17 = vld [vmem:[%s2445_s12 + $0xc0] sm:$0xff] }
 0x143   : > { %1295 = vst.msk [vmem:[%s2455_s16 + $0x168] sm:$0xff] %vm1250_vm14, %v1240_v10  ;;  %v1031_v10 = vld [vmem:[%s2445_s12 + $0xc8] sm:$0xff] }
 0x144   : > { %1252 = vst [vmem:[%s2455_s16 + $0x10] sm:$0xff] %v1197_v62 }
 0x145   : > { %v1083_v38 = vpop.permute.xlu2 %1082  ;;  %1253 = vst.msk [vmem:[%s2455_s16 + $0x18] sm:$0xff] %vm1250_vm14, %v1198_v4 }
 0x146   : > { %v1203_v11 = vmul.f32 %v1083_v38, %v1014_v56  ;;  %v1204_v20 = vmul.f32 %v1083_v38, %v1015_v44  ;;  %v1044_v44 = vld [vmem:[%s2445_s12 + $0x130] sm:$0xff]  ;;  %v1045_v38 = vld [vmem:[%s2445_s12 + $0x138] sm:$0xff] }
 0x148   : > { %1258 = vst [vmem:[%s2455_s16 + $0x40] sm:$0xff] %v1203_v11 }
 0x149   : > { %1259 = vst.msk [vmem:[%s2455_s16 + $0x48] sm:$0xff] %vm1250_vm14, %v1204_v20  ;;  %v1018_v20 = vld [vmem:[%s2445_s12 + $0x60] sm:$0xff] }
 0x14b   : > { %v1073_v13 = vpop.permute.xlu1 %1072 }
 0x14c   : > { %v1199_v41 = vmul.f32 %v1073_v13, %v1010_v59  ;;  %v1200_v25 = vmul.f32 %v1073_v13, %v1011_v24  ;;  %v1019_v59 = vld [vmem:[%s2445_s12 + $0x68] sm:$0xff] }
 0x14e   : > { %1254 = vst [vmem:[%s2455_s16 + $0x20] sm:$0xff] %v1199_v41  ;;  %v1138_v0 = vpop.permute.xlu0 %1137 }
 0x14f   : > { %1255 = vst.msk [vmem:[%s2455_s16 + $0x28] sm:$0xff] %vm1250_vm14, %v1200_v25  ;;  %v1225_v54 = vmul.f32 %v1138_v0, %v1036_v40  ;;  %v1226_v31 = vmul.f32 %v1138_v0, %v1037_v61  ;;  %v1032_v61 = vld [vmem:[%s2445_s12 + $0xd0] sm:$0xff] }
 0x150   : > { %v1118_v43 = vpop.permute.xlu2 %1117 }
 0x151   : > { %v1217_v26 = vmul.f32 %v1118_v43, %v1028_v52  ;;  %v1218_v27 = vmul.f32 %v1118_v43, %v1029_v18  ;;  %1280 = vst [vmem:[%s2455_s16 + $0xf0] sm:$0xff] %v1225_v54  ;;  %v1033_v52 = vld [vmem:[%s2445_s12 + $0xd8] sm:$0xff]  ;;  %v1055_v43 = vld [vmem:[%s2445_s12 + $0x188] sm:$0xff] }
 0x152   : > { %1281 = vst.msk [vmem:[%s2455_s16 + $0xf8] sm:$0xff] %vm1250_vm14, %v1226_v31  ;;  %v1054_v31 = vld [vmem:[%s2445_s12 + $0x180] sm:$0xff] }
 0x153   : > { %1272 = vst [vmem:[%s2455_s16 + $0xb0] sm:$0xff] %v1217_v26 }
 0x154   : > { %1273 = vst.msk [vmem:[%s2455_s16 + $0xb8] sm:$0xff] %vm1250_vm14, %v1218_v27 }
 0x157   : > { %v1143_v53 = vpop.permute.xlu1 %1142 }
 0x158   : > { %v1227_v14 = vmul.f32 %v1143_v53, %v1038_v6  ;;  %v1228_v32 = vmul.f32 %v1143_v53, %v1039_v12  ;;  %v1056_v12 = vld [vmem:[%s2445_s12 + $0x190] sm:$0xff]  ;;  %v1057_v53 = vld [vmem:[%s2445_s12 + $0x198] sm:$0xff] }
 0x15a   : > { %v1088_v37 = vpop.permute.xlu2 %1087  ;;  %1282 = vst [vmem:[%s2455_s16 + $0x100] sm:$0xff] %v1227_v14  ;;  %v1108_v9 = vpop.permute.xlu0 %1107 }
 0x15b   : > { %v1205_v51 = vmul.f32 %v1088_v37, %v1016_v48  ;;  %v1206_v39 = vmul.f32 %v1088_v37, %v1017_v28  ;;  %1283 = vst.msk [vmem:[%s2455_s16 + $0x108] sm:$0xff] %vm1250_vm14, %v1228_v32  ;;  %v1213_v22 = vmul.f32 %v1108_v9, %v1024_v34  ;;  %v1214_v21 = vmul.f32 %v1108_v9, %v1025_v33 }
 0x15d   : > { %1260 = vst [vmem:[%s2455_s16 + $0x50] sm:$0xff] %v1205_v51 }
 0x15e   : > { %1261 = vst.msk [vmem:[%s2455_s16 + $0x58] sm:$0xff] %vm1250_vm14, %v1206_v39 }
 0x15f   : > { %1268 = vst [vmem:[%s2455_s16 + $0x90] sm:$0xff] %v1213_v22 }
 0x160   : > { %1269 = vst.msk [vmem:[%s2455_s16 + $0x98] sm:$0xff] %vm1250_vm14, %v1214_v21 }
 0x161   : > { %v1078_v35 = vpop.permute.xlu1 %1077 }
 0x162   : > { %v1163_v46 = vpop.permute.xlu2 %1162  ;;  %v1201_v30 = vmul.f32 %v1078_v35, %v1012_v29  ;;  %v1202_v23 = vmul.f32 %v1078_v35, %v1013_v45 }
 0x163   : > { %v1235_v2 = vmul.f32 %v1163_v46, %v1046_v57  ;;  %v1236_v49 = vmul.f32 %v1163_v46, %v1047_v42 }
 0x164   : > { %1256 = vst [vmem:[%s2455_s16 + $0x30] sm:$0xff] %v1201_v30 }
 0x165   : > { %1290 = vst [vmem:[%s2455_s16 + $0x140] sm:$0xff] %v1235_v2  ;;  %v1153_v15 = vpop.permute.xlu0 %1152 }
 0x166   : > { %1291 = vst.msk [vmem:[%s2455_s16 + $0x148] sm:$0xff] %vm1250_vm14, %v1236_v49  ;;  %v1231_v47 = vmul.f32 %v1153_v15, %v1042_v50  ;;  %v1232_v55 = vmul.f32 %v1153_v15, %v1043_v63 }
 0x167   : > { %1257 = vst.msk [vmem:[%s2455_s16 + $0x38] sm:$0xff] %vm1250_vm14, %v1202_v23 }
 0x168   : > { %1286 = vst [vmem:[%s2455_s16 + $0x120] sm:$0xff] %v1231_v47 }
 0x169   : > { %1287 = vst.msk [vmem:[%s2455_s16 + $0x128] sm:$0xff] %vm1250_vm14, %v1232_v55 }
 0x16b   : > { %v1113_v19 = vpop.permute.xlu1 %1112 }
 0x16c   : > { %v1193_v16 = vpop.permute.xlu2 %1192  ;;  %v1215_v5 = vmul.f32 %v1113_v19, %v1026_v58  ;;  %v1216_v36 = vmul.f32 %v1113_v19, %v1027_v3 }
 0x16d   : > { %v1247_v7 = vmul.f32 %v1193_v16, %v1058_v60  ;;  %v1248_v8 = vmul.f32 %v1193_v16, %v1059_v1 }
 0x16e   : > { %1270 = vst [vmem:[%s2455_s16 + $0xa0] sm:$0xff] %v1215_v5  ;;  %v1123_v62 = vpop.permute.xlu0 %1122 }
 0x16f   : > { %1302 = vst [vmem:[%s2455_s16 + $0x1a0] sm:$0xff] %v1247_v7  ;;  %v1219_v4 = vmul.f32 %v1123_v62, %v1030_v17  ;;  %v1220_v56 = vmul.f32 %v1123_v62, %v1031_v10 }
 0x170   : > { %1303 = vst.msk [vmem:[%s2455_s16 + $0x1a8] sm:$0xff] %vm1250_vm14, %v1248_v8 }
 0x171   : > { %1271 = vst.msk [vmem:[%s2455_s16 + $0xa8] sm:$0xff] %vm1250_vm14, %v1216_v36 }
 0x172   : > { %1274 = vst [vmem:[%s2455_s16 + $0xc0] sm:$0xff] %v1219_v4 }
 0x173   : > { %1275 = vst.msk [vmem:[%s2455_s16 + $0xc8] sm:$0xff] %vm1250_vm14, %v1220_v56 }
 0x175   : > { %v1158_v11 = vpop.permute.xlu1 %1157 }
 0x176   : > { %v1233_v24 = vmul.f32 %v1158_v11, %v1044_v44  ;;  %v1234_v13 = vmul.f32 %v1158_v11, %v1045_v38 }
 0x177   : > { %v1093_v41 = vpop.permute.xlu0 %1092 }
 0x178   : > { %1288 = vst [vmem:[%s2455_s16 + $0x130] sm:$0xff] %v1233_v24  ;;  %v1207_v25 = vmul.f32 %v1093_v41, %v1018_v20  ;;  %v1208_v40 = vmul.f32 %v1093_v41, %v1019_v59 }
 0x179   : > { %1289 = vst.msk [vmem:[%s2455_s16 + $0x138] sm:$0xff] %vm1250_vm14, %v1234_v13 }
 0x17a   : > { %1262 = vst [vmem:[%s2455_s16 + $0x60] sm:$0xff] %v1207_v25 }
 0x17b   : > { %1263 = vst.msk [vmem:[%s2455_s16 + $0x68] sm:$0xff] %vm1250_vm14, %v1208_v40 }
 0x17d   : > { %v1128_v18 = vpop.permute.xlu1 %1127 }
 0x17e   : > { %v1221_v0 = vmul.f32 %v1128_v18, %v1032_v61  ;;  %v1222_v54 = vmul.f32 %v1128_v18, %v1033_v52 }
 0x180   : > { %1276 = vst [vmem:[%s2455_s16 + $0xd0] sm:$0xff] %v1221_v0 }
 0x181   : > { %1277 = vst.msk [vmem:[%s2455_s16 + $0xd8] sm:$0xff] %vm1250_vm14, %v1222_v54  ;;  %v1183_v26 = vpop.permute.xlu0 %1182 }
 0x182   : > { %v1243_v27 = vmul.f32 %v1183_v26, %v1054_v31  ;;  %v1244_v6 = vmul.f32 %v1183_v26, %v1055_v43 }
 0x184   : > { %1298 = vst [vmem:[%s2455_s16 + $0x180] sm:$0xff] %v1243_v27 }
 0x185   : > { %1299 = vst.msk [vmem:[%s2455_s16 + $0x188] sm:$0xff] %vm1250_vm14, %v1244_v6 }
 0x186   : > { %v1188_v48 = vpop.permute.xlu1 %1187 }
 0x187   : > { %v1245_v28 = vmul.f32 %v1188_v48, %v1056_v12  ;;  %v1246_v14 = vmul.f32 %v1188_v48, %v1057_v53 }
 0x189   : > { %1300 = vst [vmem:[%s2455_s16 + $0x190] sm:$0xff] %v1245_v28 }
 0x18a   : > { %1301 = vst.msk [vmem:[%s2455_s16 + $0x198] sm:$0xff] %vm1250_vm14, %v1246_v14 }
 0x18b PF: > { %s14_s15 = sadd.s32 1, %s1597_s15  }
 0x18c   : > { %p11_p4 = scmp.ge.s32.totalorder %s14_s15, 6  }
 0x18e   :  { %13 = sbr.rel (!%p11_p4) target bundleno = 1 (0x1), region = 72 }

</bundles_post_ra>
